<compile_context>
chip_gen: v5e
topology: v5e:2x2
jax: 0.10.0
libtpu: 0.0.40
codegen_flags: <defaults>
</compile_context>

<pallas_src>
import functools

import jax
import jax.numpy as jnp
from jax.experimental import pallas as pl
from jax.experimental.pallas import tpu as pltpu


def _round_up(x, m):
    return (x + m - 1) // m * m


def _irmv1_tile_kernel(logits_ref, y_ref, env_ref,
                       nll_out, sq_out, cnt_out, *, ne_pad):
    logits = logits_ref[...].astype(jnp.float32)     # (tile_n, C)  f32 compute
    y = y_ref[...]                                    # (tile_n, 1)  int32
    env = env_ref[...]                                # (tile_n, 1)  int32
    tile_n, c = logits.shape

    # one-hot targets (TPU needs >=2D iota)
    col = jax.lax.broadcasted_iota(jnp.int32, (tile_n, c), 1)
    onehot = (col == y).astype(jnp.float32)           # (tile_n, C)

    # numerically-stable softmax / log-softmax with a single exp pass
    row_max = jnp.max(logits, axis=-1, keepdims=True)
    z = logits - row_max
    ez = jnp.exp(z)
    s = jnp.sum(ez, axis=-1, keepdims=True)
    p = ez * (1.0 / s)
    log_s = jnp.log(s)

    # per-sample CE and squared-gradient norm
    z_y = jnp.sum(onehot * z, axis=-1, keepdims=True)
    nll = log_s - z_y                                 # (tile_n, 1)
    p_y = jnp.sum(onehot * p, axis=-1, keepdims=True)
    pp = jnp.sum(p * p, axis=-1, keepdims=True)
    sq = pp - 2.0 * p_y + 1.0                         # (tile_n, 1) = ||p - onehot||^2

    # per-env partial sums for this tile, lane-dense (128-wide env axis)
    ecol = jax.lax.broadcasted_iota(jnp.int32, (tile_n, ne_pad), 1)
    mask = (ecol == env).astype(jnp.float32)          # (tile_n, ne_pad)

    nll_out[0] = jnp.sum(mask * nll, axis=0, keepdims=True)   # (1, ne_pad)
    sq_out[0] = jnp.sum(mask * sq, axis=0, keepdims=True)
    cnt_out[0] = jnp.sum(mask, axis=0, keepdims=True)


def irmv1_loss(logits, y, env_idx, *, n_envs, lambda_irm=1.0):
    n, c = logits.shape
    y2 = y.reshape(n, 1).astype(jnp.int32)
    env2 = env_idx.reshape(n, 1).astype(jnp.int32)

    # tile over N: keep ~2 MiB of f32 compute per tile so double-buffered
    # inputs + intermediates stay well under the scoped VMEM limit on all gens.
    tile_n = max(8, min(1024, ((2 << 20) // (c * 4)) // 8 * 8))
    tile_n = min(tile_n, _round_up(n, 8))
    n_pad = _round_up(n, tile_n)
    num_tiles = n_pad // tile_n
    ne_pad = max(128, _round_up(n_envs, 128))

    if n_pad != n:
        pad = n_pad - n
        logits = jnp.pad(logits, ((0, pad), (0, 0)))
        y2 = jnp.pad(y2, ((0, pad), (0, 0)))
        # padded rows get env index == n_envs -> dropped by the [:n_envs] slice below
        env2 = jnp.pad(env2, ((0, pad), (0, 0)), constant_values=n_envs)

    kernel = functools.partial(_irmv1_tile_kernel, ne_pad=ne_pad)
    part_shape = jax.ShapeDtypeStruct((num_tiles, 1, ne_pad), jnp.float32)
    part_spec = pl.BlockSpec((1, 1, ne_pad), lambda i: (i, 0, 0))

    nll_p, sq_p, cnt_p = pl.pallas_call(
        kernel,
        out_shape=(part_shape, part_shape, part_shape),
        grid=(num_tiles,),
        in_specs=[
            pl.BlockSpec((tile_n, c), lambda i: (i, 0)),   # logits (native dtype in HBM)
            pl.BlockSpec((tile_n, 1), lambda i: (i, 0)),   # y
            pl.BlockSpec((tile_n, 1), lambda i: (i, 0)),   # env
        ],
        out_specs=(part_spec, part_spec, part_spec),
        compiler_params=pltpu.CompilerParams(
            dimension_semantics=("parallel",),
            vmem_limit_bytes=32 * 1024 * 1024,
        ),
    )(logits, y2, env2)

    # finalize: combine tiny per-tile / per-env partials in plain JAX.
    nll_sum = jnp.sum(nll_p, axis=(0, 1))[:n_envs]
    sq_sum = jnp.sum(sq_p, axis=(0, 1))[:n_envs]
    cnt = jnp.sum(cnt_p, axis=(0, 1))[:n_envs]
    loss = jnp.sum(nll_sum / cnt)
    penalty = jnp.sum(sq_sum / (cnt * cnt))
    return loss / n_envs + lambda_irm * penalty


def _reference(logits, y, env_idx, n_envs, lambda_irm=1.0):
    """Pure-JAX reference for sanity checking."""
    logits = logits.astype(jnp.float32)
    logp = jax.nn.log_softmax(logits, axis=-1)
    p = jnp.exp(logp)
    onehot = jax.nn.one_hot(y, logits.shape[-1], dtype=jnp.float32)
    nll = -jnp.sum(onehot * logp, axis=-1)
    sq = jnp.sum((p - onehot) ** 2, axis=-1)
    loss = 0.0
    penalty = 0.0
    for e in range(n_envs):
        mask = (env_idx == e).astype(jnp.float32)
        ne = jnp.sum(mask)
        loss = loss + jnp.sum(mask * nll) / ne
        penalty = penalty + jnp.sum(mask * sq) / (ne * ne)
    return loss / n_envs + lambda_irm * penalty


if __name__ == "__main__":
    key = jax.random.PRNGKey(0)
    k1, k2 = jax.random.split(key)

    N, C = 12, 16  # 12 samples, 16 classes (N not a multiple of 8 -> exercises padding)
    logits = jax.random.normal(k1, (N, C), dtype=jnp.float32)
    y = jax.random.randint(k2, (N,), 0, C, dtype=jnp.int32)
    env_idx = jnp.array([0, 0, 0, 1, 1, 1, 0, 0, 1, 1, 0, 1], dtype=jnp.int32)

    n_envs = int(jnp.unique(env_idx).size)   # matches env_idx.unique().numel()
    lambda_irm = 1.0

    out = irmv1_loss(logits, y, env_idx, n_envs=n_envs, lambda_irm=lambda_irm)
    out = jax.block_until_ready(out)

    ref = _reference(logits, y, env_idx, n_envs, lambda_irm)
    assert jnp.allclose(out, ref, rtol=1e-5, atol=1e-5), (out, ref)

    print("KERNEL_OK")
</pallas_src>

<mosaic_0001>
module attributes {stable_mosaic.version = 11 : i64} {
  func.func @_irmv1_tile_kernel(%arg0: i32, %arg1: memref<16x16xf32, #tpu.memory_space<vmem>>, %arg2: memref<16x1xi32, #tpu.memory_space<vmem>>, %arg3: memref<16x1xi32, #tpu.memory_space<vmem>>, %arg4: memref<1x1x128xf32, #tpu.memory_space<vmem>>, %arg5: memref<1x1x128xf32, #tpu.memory_space<vmem>>, %arg6: memref<1x1x128xf32, #tpu.memory_space<vmem>>) attributes {dimension_semantics = [#tpu.dimension_semantics<parallel>], iteration_bounds = array<i64: 1>, scalar_prefetch = 0 : i64, scratch_operands = 0 : i64, tpu.core_type = #tpu.core_type<tc>, window_params = [{transform_indices = @transform_0, window_bounds = array<i64: 16, 16>}, {transform_indices = @transform_1, window_bounds = array<i64: 16, 1>}, {transform_indices = @transform_2, window_bounds = array<i64: 16, 1>}, {transform_indices = @transform_3, window_bounds = array<i64: 1, 1, 128>}, {transform_indices = @transform_4, window_bounds = array<i64: 1, 1, 128>}, {transform_indices = @transform_5, window_bounds = array<i64: 1, 1, 128>}]} {
    %c0 = arith.constant 0 : index
    %c0_0 = arith.constant 0 : index
    %0 = vector.load %arg1[%c0, %c0_0] : memref<16x16xf32, #tpu.memory_space<vmem>>, vector<16x16xf32>
    %c0_1 = arith.constant 0 : index
    %c0_2 = arith.constant 0 : index
    %1 = vector.load %arg2[%c0_1, %c0_2] : memref<16x1xi32, #tpu.memory_space<vmem>>, vector<16x1xi32>
    %c0_3 = arith.constant 0 : index
    %c0_4 = arith.constant 0 : index
    %2 = vector.load %arg3[%c0_3, %c0_4] : memref<16x1xi32, #tpu.memory_space<vmem>>, vector<16x1xi32>
    %3 = tpu.iota {dimensions = array<i32: 1>} : vector<16x16xi32>
    %4 = vector.broadcast %1 : vector<16x1xi32> to vector<16x16xi32>
    %5 = arith.cmpi eq, %3, %4 : vector<16x16xi32>
    %6 = arith.extui %5 : vector<16x16xi1> to vector<16x16xi32>
    %7 = arith.sitofp %6 : vector<16x16xi32> to vector<16x16xf32>
    %cst = arith.constant dense<0xFF800000> : vector<16xf32>
    %8 = vector.multi_reduction <maximumf>, %0, %cst [1] : vector<16x16xf32> to vector<16xf32>
    %9 = vector.shape_cast %8 : vector<16xf32> to vector<16x1xf32>
    %10 = vector.broadcast %9 : vector<16x1xf32> to vector<16x16xf32>
    %11 = arith.subf %0, %10 : vector<16x16xf32>
    %12 = math.exp %11 : vector<16x16xf32>
    %cst_5 = arith.constant dense<0.000000e+00> : vector<16xf32>
    %13 = vector.multi_reduction <add>, %12, %cst_5 [1] : vector<16x16xf32> to vector<16xf32>
    %14 = vector.shape_cast %13 : vector<16xf32> to vector<16x1xf32>
    %cst_6 = arith.constant 1.000000e+00 : f32
    %15 = vector.broadcast %cst_6 : f32 to vector<16x1xf32>
    %16 = arith.divf %15, %14 : vector<16x1xf32>
    %17 = vector.broadcast %16 : vector<16x1xf32> to vector<16x16xf32>
    %18 = arith.mulf %12, %17 : vector<16x16xf32>
    %19 = math.log %14 : vector<16x1xf32>
    %20 = arith.mulf %7, %11 : vector<16x16xf32>
    %cst_7 = arith.constant dense<0.000000e+00> : vector<16xf32>
    %21 = vector.multi_reduction <add>, %20, %cst_7 [1] : vector<16x16xf32> to vector<16xf32>
    %22 = vector.shape_cast %21 : vector<16xf32> to vector<16x1xf32>
    %23 = arith.subf %19, %22 : vector<16x1xf32>
    %24 = arith.mulf %7, %18 : vector<16x16xf32>
    %cst_8 = arith.constant dense<0.000000e+00> : vector<16xf32>
    %25 = vector.multi_reduction <add>, %24, %cst_8 [1] : vector<16x16xf32> to vector<16xf32>
    %26 = vector.shape_cast %25 : vector<16xf32> to vector<16x1xf32>
    %27 = arith.mulf %18, %18 : vector<16x16xf32>
    %cst_9 = arith.constant dense<0.000000e+00> : vector<16xf32>
    %28 = vector.multi_reduction <add>, %27, %cst_9 [1] : vector<16x16xf32> to vector<16xf32>
    %29 = vector.shape_cast %28 : vector<16xf32> to vector<16x1xf32>
    %cst_10 = arith.constant 2.000000e+00 : f32
    %30 = vector.broadcast %cst_10 : f32 to vector<16x1xf32>
    %31 = arith.mulf %30, %26 : vector<16x1xf32>
    %32 = arith.subf %29, %31 : vector<16x1xf32>
    %cst_11 = arith.constant 1.000000e+00 : f32
    %33 = vector.broadcast %cst_11 : f32 to vector<16x1xf32>
    %34 = arith.addf %32, %33 : vector<16x1xf32>
    %35 = tpu.iota {dimensions = array<i32: 1>} : vector<16x128xi32>
    %36 = vector.broadcast %2 : vector<16x1xi32> to vector<16x128xi32>
    %37 = arith.cmpi eq, %35, %36 : vector<16x128xi32>
    %38 = arith.extui %37 : vector<16x128xi1> to vector<16x128xi32>
    %39 = arith.sitofp %38 : vector<16x128xi32> to vector<16x128xf32>
    %40 = vector.broadcast %23 : vector<16x1xf32> to vector<16x128xf32>
    %41 = arith.mulf %39, %40 : vector<16x128xf32>
    %cst_12 = arith.constant dense<0.000000e+00> : vector<128xf32>
    %42 = vector.multi_reduction <add>, %41, %cst_12 [0] : vector<16x128xf32> to vector<128xf32>
    %43 = vector.shape_cast %42 : vector<128xf32> to vector<1x128xf32>
    %c0_13 = arith.constant 0 : index
    %c0_14 = arith.constant 0 : index
    %c0_15 = arith.constant 0 : index
    %44 = vector.load %arg4[%c0_13, %c0_14, %c0_15] : memref<1x1x128xf32, #tpu.memory_space<vmem>>, vector<1x1x128xf32>
    %45 = vector.shape_cast %44 : vector<1x1x128xf32> to vector<1x128xf32>
    %46 = vector.shape_cast %43 : vector<1x128xf32> to vector<1x1x128xf32>
    tpu.vector_store %arg4[%c0_13, %c0_14, %c0_15], %46 {strides = array<i32>} : memref<1x1x128xf32, #tpu.memory_space<vmem>>, vector<1x1x128xf32>,
    %47 = vector.broadcast %34 : vector<16x1xf32> to vector<16x128xf32>
    %48 = arith.mulf %39, %47 : vector<16x128xf32>
    %cst_16 = arith.constant dense<0.000000e+00> : vector<128xf32>
    %49 = vector.multi_reduction <add>, %48, %cst_16 [0] : vector<16x128xf32> to vector<128xf32>
    %50 = vector.shape_cast %49 : vector<128xf32> to vector<1x128xf32>
    %c0_17 = arith.constant 0 : index
    %c0_18 = arith.constant 0 : index
    %c0_19 = arith.constant 0 : index
    %51 = vector.load %arg5[%c0_17, %c0_18, %c0_19] : memref<1x1x128xf32, #tpu.memory_space<vmem>>, vector<1x1x128xf32>
    %52 = vector.shape_cast %51 : vector<1x1x128xf32> to vector<1x128xf32>
    %53 = vector.shape_cast %50 : vector<1x128xf32> to vector<1x1x128xf32>
    tpu.vector_store %arg5[%c0_17, %c0_18, %c0_19], %53 {strides = array<i32>} : memref<1x1x128xf32, #tpu.memory_space<vmem>>, vector<1x1x128xf32>,
    %cst_20 = arith.constant dense<0.000000e+00> : vector<128xf32>
    %54 = vector.multi_reduction <add>, %39, %cst_20 [0] : vector<16x128xf32> to vector<128xf32>
    %55 = vector.shape_cast %54 : vector<128xf32> to vector<1x128xf32>
    %c0_21 = arith.constant 0 : index
    %c0_22 = arith.constant 0 : index
    %c0_23 = arith.constant 0 : index
    %56 = vector.load %arg6[%c0_21, %c0_22, %c0_23] : memref<1x1x128xf32, #tpu.memory_space<vmem>>, vector<1x1x128xf32>
    %57 = vector.shape_cast %56 : vector<1x1x128xf32> to vector<1x128xf32>
    %58 = vector.shape_cast %55 : vector<1x128xf32> to vector<1x1x128xf32>
    tpu.vector_store %arg6[%c0_21, %c0_22, %c0_23], %58 {strides = array<i32>} : memref<1x1x128xf32, #tpu.memory_space<vmem>>, vector<1x1x128xf32>,
    return
  }
  func.func @transform_0(%arg0: i32) -> (i32, i32) {
    %c0_i32 = arith.constant 0 : i32
    %c0_i32_0 = arith.constant 0 : i32
    return %arg0, %c0_i32 : i32, i32
  }
  func.func @transform_1(%arg0: i32) -> (i32, i32) {
    %c0_i32 = arith.constant 0 : i32
    %c0_i32_0 = arith.constant 0 : i32
    return %arg0, %c0_i32 : i32, i32
  }
  func.func @transform_2(%arg0: i32) -> (i32, i32) {
    %c0_i32 = arith.constant 0 : i32
    %c0_i32_0 = arith.constant 0 : i32
    return %arg0, %c0_i32 : i32, i32
  }
  func.func @transform_3(%arg0: i32) -> (i32, i32, i32) {
    %c0_i32 = arith.constant 0 : i32
    %c0_i32_0 = arith.constant 0 : i32
    %c0_i32_1 = arith.constant 0 : i32
    return %arg0, %c0_i32, %c0_i32_0 : i32, i32, i32
  }
  func.func @transform_4(%arg0: i32) -> (i32, i32, i32) {
    %c0_i32 = arith.constant 0 : i32
    %c0_i32_0 = arith.constant 0 : i32
    %c0_i32_1 = arith.constant 0 : i32
    return %arg0, %c0_i32, %c0_i32_0 : i32, i32, i32
  }
  func.func @transform_5(%arg0: i32) -> (i32, i32, i32) {
    %c0_i32 = arith.constant 0 : i32
    %c0_i32_0 = arith.constant 0 : i32
    %c0_i32_1 = arith.constant 0 : i32
    return %arg0, %c0_i32, %c0_i32_0 : i32, i32, i32
  }
}

</mosaic_0001>

<bundles_post_ra>
// kernel: tpu_custom_call.1
= control target key start
LH: loop header
LB: loop body
LE: loop exit
PB: predicated region body
PF: predicated region fallthrough
CT: control target
= control target key end

     0   :  { %11 = vsyncpa [#allocation3], 0  ;;  %vm39_vm0 = vcmask 130048   ;;  %v313_v3 = vmov 0   ;;  %s407_s0 = inlined_call_operand.vmem [shape: f32[16,16], index: 0, kind: input, shape index: {}]   ;;  %s408_s1 = inlined_call_operand.vmem [shape: s32[16,1], index: 1, kind: input, shape index: {}]   ;;  %s409_s2 = inlined_call_operand.vmem [shape: s32[16,1], index: 2, kind: input, shape index: {}]   ;;  %s410_s3 = inlined_call_operand.hbm [shape: f32[1,1,128], index: 3, kind: output, shape index: {0}]   ;;  %s411_s4 = inlined_call_operand.hbm [shape: f32[1,1,128], index: 4, kind: output, shape index: {1}]   ;;  %s412_s5 = inlined_call_operand.hbm [shape: f32[1,1,128], index: 5, kind: output, shape index: {2}]  }
   0x1   :  { %v19_v0 = vld [vmem:[%s407_s0] sm:$0xff]  ;;  %222 = vset.pattern.permute.xlu2 %v313_v3  ;;  %224 = vset.pattern.permute.xlu0 %v313_v3 }
   0x2   :  { %v21_v1 = vld [vmem:[%s408_s1] sm:$0xff]  ;;  %v40_v2 = vsel %vm39_vm0, %v19_v0, -inf }
   0x3   :  { %12 = vsyncpa [#allocation5], 0  ;;  %41 = vmax.xlane.f32.xlu0 %v40_v2  ;;  %28 = vperm.xlu2 %222, %v21_v1   ;;  %v20_v4 = vld [vmem:[%s407_s0 + $0x8] sm:$0xff]  ;;  %v25_v20 = vlaneseq  ;;  %v314_v37 = vmov 0.0   ;;  %v23_v61 = vld [vmem:[%s409_s2] sm:$0xff]  ;;  %s184_s6 = sshll.u32 %s411_s4, 4  ;;  %s185_s6 = int_to_ptr.hbm [resolvable:$true] %s184_s6 }
   0x4   :  { %223 = vset.pattern.permute.xlu1 %v313_v3  ;;  %v43_v5 = vsel %vm39_vm0, %v20_v4, -inf  ;;  %v22_v6 = vld [vmem:[%s408_s1 + $0x8] sm:$0xff]  ;;  %s316_s7 = smov [#allocation2]   ;;  %s173_s11 = sshll.u32 %s410_s3, 4  ;;  %s174_s11 = int_to_ptr.hbm [resolvable:$true] %s173_s11 }
   0x5   :  { %v372_v25 = vand.u32 127, %v25_v20  ;;  %v24_v60 = vld [vmem:[%s409_s2 + $0x8] sm:$0xff]  ;;  %s315_s2 = smov [#allocation4]   ;;  %s171_s8 = sshll.u32 %s316_s7, 4  ;;  %s172_s8 = int_to_ptr.vmem [resolvable:$true] %s171_s8 }
   0x6   :  { %s182_s28 = sshll.u32 %s315_s2, 4  ;;  %s317_s12 = smov [#allocation6]   ;;  %s183_s28 = int_to_ptr.vmem [resolvable:$true] %s182_s28 }
   0x7   :  { %s193_s13 = sshll.u32 %s317_s12, 4  ;;  %s195_s16 = sshll.u32 %s412_s5, 4  ;;  %s194_s13 = int_to_ptr.vmem [resolvable:$true] %s193_s13  ;;  %s196_s16 = int_to_ptr.hbm [resolvable:$true] %s195_s16 }
   0xb   :  { %44 = vmax.xlane.f32.xlu0 %v43_v5  ;;  %31 = vperm.xlu2 %222, %v22_v6  }
  0x5d   :  { %v29_v18 = vpop.permute.xlu2 %28 }
  0x5e   :  { %vm33_vm4 = vcmp.eq.s32.totalorder %v372_v25, %v29_v18 }
  0x5f   :  { %v213_v38 = vsel %vm33_vm4, 1.0, %v314_v37 }
  0x65   :  { %v32_v31 = vpop.permute.xlu2 %31 }
  0x66   :  { %vm34_vm6 = vcmp.eq.s32.totalorder %v372_v25, %v32_v31 }
  0x67   :  { %v214_v47 = vsel %vm34_vm6, 1.0, %v314_v37 }
  0x76   :  { %v42_v7 = vpop.xlane.xlu0 %41 }
  0x77   :  { %v362_v8 = vsub.f32 %v19_v0, %v42_v7 }
  0x79   :  { %v48_v9 = vmul.f32 1.442695, %v362_v8  ;;  %v94_v57 = vmul.f32 %v213_v38, %v362_v8 }
  0x7b   :  { %225 = vpow2.f32 %v48_v9  ;;  %v96_v59 = vsel %vm39_vm0, %v94_v57, 0.0 }
  0x7e   :  { %v45_v10 = vpop.xlane.xlu0 %44 }
  0x7f   :  { %v47_v11 = vsub.f32 %v20_v4, %v45_v10 }
  0x81   :  { %v226_v12 = vpop.eup %225  ;;  %v50_v13 = vmul.f32 1.442695, %v47_v11  ;;  %v95_v51 = vmul.f32 %v214_v47, %v47_v11 }
  0x82   :  { %v52_v14 = vsel %vm39_vm0, %v226_v12, 0.0 }
  0x83   :  { %227 = vpow2.f32 %v50_v13  ;;  %53 = vadd.xlane.f32.xlu1 %v52_v14  ;;  %v99_v54 = vsel %vm39_vm0, %v95_v51, 0.0 }
  0x89   :  { %v228_v15 = vpop.eup %227 }
  0x8a   :  { %v55_v16 = vsel %vm39_vm0, %v228_v15, 0.0 }
  0x8b   :  { %56 = vadd.xlane.f32.xlu1 %v55_v16 }
  0xf6   :  { %v367_v17 = vpop.xlane.xlu1 %53 }
  0xf7   :  { %229 = vrcp.f32 %v367_v17  ;;  %v69_v24 = vand.u32 2147483648, %v367_v17  ;;  %v67_v27 = vand.u32 2147483647, %v367_v17  ;;  %vm63_vm2 = vweird.f32 %v367_v17 }
  0xf9   :  { %v70_v30 = vor.u32 1.1754944e-38, %v69_v24  ;;  %vm68_vm5 = vcmp.eq.f32.partialorder %v67_v27, 8.507059e+37 }
  0xfd   :  { %v230_v19 = vpop.eup %229 }
  0xfe   :  { %v59_v21 = vmul.f32 %v230_v19, %v367_v17  ;;  %v57_v22 = vpop.xlane.xlu1 %56  ;;  %vm64_vm1 = vweird.f32 %v230_v19 }
  0xff   :  { %231 = vrcp.f32 %v57_v22  ;;  %vm65_vm3 = vmor %vm63_vm2, %vm64_vm1  ;;  %v82_v39 = vand.u32 2147483647, %v57_v22  ;;  %v84_v40 = vand.u32 2147483648, %v57_v22  ;;  %vm78_vm8 = vweird.f32 %v57_v22 }
 0x100   :  { %v60_v23 = vsub.f32 1.0, %v59_v21  ;;  %233 = vlog2.f32 %v57_v22 }
 0x101   :  { %v85_v48 = vor.u32 1.1754944e-38, %v84_v40  ;;  %vm83_vm10 = vcmp.eq.f32.partialorder %v82_v39, 8.507059e+37  ;;  %235 = vlog2.f32 %v367_v17 }
 0x102   :  { %v61_v26 = vmul.f32 %v230_v19, %v60_v23 }
 0x104   :  { %v62_v28 = vadd.f32 %v230_v19, %v61_v26 }
 0x105   :  { %v232_v29 = vpop.eup %231 }
 0x106   :  { %v74_v32 = vmul.f32 %v232_v29, %v57_v22  ;;  %v66_v33 = vsel %vm65_vm3, %v230_v19, %v62_v28  ;;  %vm79_vm7 = vweird.f32 %v232_v29  ;;  %v234_v4 = vpop.eup %233 }
 0x107   :  { %v71_v34 = vsel %vm68_vm5, %v70_v30, %v66_v33  ;;  %vm80_vm9 = vmor %vm78_vm8, %vm79_vm7  ;;  %v236_v7 = vpop.eup %235  ;;  %v93_v11 = vmul.f32 0.6931472, %v234_v4 }
 0x108   :  { %v75_v35 = vsub.f32 1.0, %v74_v32  ;;  %v88_v36 = vmul.f32 %v226_v12, %v71_v34  ;;  %v91_v12 = vmul.f32 0.6931472, %v236_v7 }
 0x10a   :  { %v112_v41 = vmul.f32 %v88_v36, %v88_v36  ;;  %v104_v42 = vmul.f32 %v213_v38, %v88_v36  ;;  %v76_v43 = vmul.f32 %v232_v29, %v75_v35 }
 0x10c   :  { %v114_v44 = vsel %vm39_vm0, %v112_v41, 0.0  ;;  %v106_v45 = vsel %vm39_vm0, %v104_v42, 0.0  ;;  %v77_v46 = vadd.f32 %v232_v29, %v76_v43 }
 0x10d   :  { %115 = vadd.xlane.f32.xlu2 %v114_v44  ;;  %107 = vadd.xlane.f32.xlu0 %v106_v45 }
 0x10e   :  { %v81_v49 = vsel %vm80_vm9, %v232_v29, %v77_v46 }
 0x10f   :  { %v86_v50 = vsel %vm83_vm10, %v85_v48, %v81_v49 }
 0x110   :  { %v89_v52 = vmul.f32 %v228_v15, %v86_v50 }
 0x112   :  { %v105_v53 = vmul.f32 %v214_v47, %v89_v52  ;;  %v113_v56 = vmul.f32 %v89_v52, %v89_v52 }
 0x114   :  { %v109_v55 = vsel %vm39_vm0, %v105_v53, 0.0  ;;  %v117_v58 = vsel %vm39_vm0, %v113_v56, 0.0 }
 0x115   :  { %100 = vadd.xlane.f32.xlu0 %v99_v54  ;;  %110 = vadd.xlane.f32.xlu1 %v109_v55 }
 0x11d   :  { %118 = vadd.xlane.f32.xlu0 %v117_v58  ;;  %97 = vadd.xlane.f32.xlu1 %v96_v59 }
 0x131   :  { %130 = vperm.xlu0 %224, %v24_v60  }
 0x136   :  { %127 = vperm.xlu1 %223, %v23_v61  }
 0x180   :  { %v108_v62 = vpop.xlane.xlu0 %107  ;;  %v116_v8 = vpop.xlane.xlu2 %115 }
 0x181   :  { %v120_v3 = vmul.f32 2.0, %v108_v62 }
 0x183   :  { %v122_v9 = vsub.f32 %v116_v8, %v120_v3 }
 0x185   :  { %v124_v16 = vadd.f32 1.0, %v122_v9 }
 0x188   :  { %v101_v63 = vpop.xlane.xlu0 %100  ;;  %v111_v0 = vpop.xlane.xlu1 %110 }
 0x189   :  { %v121_v5 = vmul.f32 2.0, %v111_v0  ;;  %v103_v14 = vsub.f32 %v93_v11, %v101_v63 }
 0x190   :  { %v119_v1 = vpop.xlane.xlu0 %118  ;;  %v98_v2 = vpop.xlane.xlu1 %97 }
 0x191   :  { %v123_v10 = vsub.f32 %v119_v1, %v121_v5  ;;  %v102_v18 = vsub.f32 %v91_v12, %v98_v2 }
 0x193   :  { %v125_v17 = vadd.f32 1.0, %v123_v10 }
 0x1a3   :  { %v131_v6 = vpop.permute.xlu0 %130 }
 0x1a4   :  { %vm133_vm11 = vcmp.eq.s32.totalorder %v372_v25, %v131_v6 }
 0x1a5   :  { %v216_v13 = vsel %vm133_vm11, 1.0, %v314_v37 }
 0x1a6   :  { %v139_v19 = vmul.f32 %v216_v13, %v103_v14  ;;  %v149_v21 = vmul.f32 %v216_v13, %v125_v17 }
 0x1a8   :  { %v128_v15 = vpop.permute.xlu1 %127 }
 0x1a9   :  { %vm132_vm12 = vcmp.eq.s32.totalorder %v372_v25, %v128_v15 }
 0x1aa   :  { %v215_v20 = vsel %vm132_vm12, 1.0, %v314_v37 }
 0x1ab   :  { %v138_v22 = vmul.f32 %v215_v20, %v102_v18  ;;  %v148_v23 = vmul.f32 %v215_v20, %v124_v16  ;;  %v158_v24 = vadd.f32 %v216_v13, %v215_v20 }
 0x1ad   :  { %v140_v26 = vadd.f32 %v139_v19, %v138_v22  ;;  %v150_v27 = vadd.f32 %v149_v21, %v148_v23  ;;  %v159_v28 = vrot.slane %v158_v24, 4 }
 0x1af   :  { %v141_v29 = vrot.slane %v140_v26, 4  ;;  %v151_v30 = vrot.slane %v150_v27, 4  ;;  %v160_v31 = vadd.f32 %v159_v28, %v158_v24 }
 0x1b1   :  { %v152_v32 = vadd.f32 %v151_v30, %v150_v27  ;;  %v161_v33 = vrot.slane %v160_v31, 2  ;;  %v142_v34 = vadd.f32 %v141_v29, %v140_v26 }
 0x1b3   :  { %v153_v35 = vrot.slane %v152_v32, 2  ;;  %v143_v36 = vrot.slane %v142_v34, 2  ;;  %v162_v38 = vadd.f32 %v161_v33, %v160_v31 }
 0x1b5   :  { %v154_v25 = vadd.f32 %v153_v35, %v152_v32  ;;  %v144_v39 = vadd.f32 %v143_v36, %v142_v34  ;;  %v163_v40 = vrot.slane %v162_v38, 1 }
 0x1b7   :  { %v155_v37 = vrot.slane %v154_v25, 1  ;;  %v145_v41 = vrot.slane %v144_v39, 1  ;;  %v164_v42 = vadd.f32 %v163_v40, %v162_v38 }
 0x1b9   :  { %v156_v43 = vadd.f32 %v155_v37, %v154_v25  ;;  %v146_v44 = vadd.f32 %v145_v41, %v144_v39  ;;  %165 = vst [vmem:[#allocation6] sm:$0x1] %v164_v42 }
 0x1bb   :  { %157 = vst [vmem:[#allocation4] sm:$0x1] %v156_v43 }
 0x1bc   :  { %187 = dma.vmem_to_hbm [thread:$0]  %s183_s28, 16, %s185_s6, [#allocation5]   ;;  %147 = vst [vmem:[#allocation2] sm:$0x1] %v146_v44 }
 0x1bd   :  { %176 = dma.vmem_to_hbm [thread:$0]  %s172_s8, 16, %s174_s11, [#allocation3]  }
 0x1be   :  { %198 = dma.vmem_to_hbm [thread:$0]  %s194_s13, 16, %s196_s16, [#allocation5]  }
 0x1bf   :  { %309 = dma.done.wait [#allocation3], 16  }
 0x1c0   :  { %310 = vsyncadd [#allocation3], 4294967280 }
 0x1c1   :  { %311 = dma.done.wait [#allocation5], 32  }
 0x1c2   :  { %312 = vsyncadd [#allocation5], 4294967264 }
 0x1c3   :  { %211 = vsyncpa [#allocation3], 1 }
 0x1c4   :  { %212 = vsyncpa [#allocation5], 1 }

</bundles_post_ra>
